<compile_context>
chip_gen: v6e
topology: v6e:2x2x1
jax: 0.10.0
libtpu: 0.0.40
codegen_flags: <defaults>
</compile_context>

<pallas_src>
import functools
import numpy as np
import jax
import jax.numpy as jnp
from jax import lax
from jax.experimental import pallas as pl
from jax.experimental.pallas import tpu as pltpu


def _transformer_kernel(src_ref, wsmall_ref, wbig_ref, brow_ref, o_ref,
                        *, seq_len, embed_size, heads, dim_in, n_rep):
    L, E, H = seq_len, embed_size, heads
    EH3 = 3 * E * H

    src = src_ref[...]                       # (L, d)  f32, one batch
    wsmall = wsmall_ref[...]                 # (d, 3*E*H)   folded QKV (Q pre-scaled)
    wbig = wbig_ref[...]                     # (E+1, E+dim_in): [wo_t | wf_t ; 0 | bf]
    brow = brow_ref[...]                     # (1, 3*E*H + 3*E): [bqkv | bo | lnw | lnb]
    d = src.shape[1]

    # --- QKV projection on the VPU: contraction dim d (=2) is far too small
    #     for the MXU, so use broadcast FMAs instead. Bias + repeat-fold +
    #     1/sqrt(E) (Q only) are already baked into wsmall / brow.
    qkv = brow[0:1, 0:EH3]                   # (1, 3EH) bias, broadcasts over rows
    for i in range(d):                       # static unroll (d == 2)
        qkv = qkv + src[:, i:i + 1] * wsmall[i:i + 1, :]
    # qkv: (L, 3EH)

    # --- local causal "keep" mask (L, L): row >= col.
    row = lax.broadcasted_iota(jnp.int32, (L, L), 0)
    col = lax.broadcasted_iota(jnp.int32, (L, L), 1)
    keep = row >= col

    acc = None
    for h in range(H):                       # static unroll (H == 1 here)
        qh = qkv[:, h * E:(h + 1) * E]
        kh = qkv[:, (H + h) * E:(H + h + 1) * E]
        vh = qkv[:, (2 * H + h) * E:(2 * H + h + 1) * E]
        # Contract dim 1 of both operands -> no explicit K transpose.
        energy = lax.dot_general(qh, kh, (((1,), (1,)), ((), ())),
                                 preferred_element_type=jnp.float32)
        energy = jnp.where(keep, energy, 0.0)        # masked_fill(mask==0, 0.)
        part = jnp.dot(energy, vh, preferred_element_type=jnp.float32)
        acc = part if acc is None else acc + part

    # --- attention output projection (fc_out of SelfAttention).
    wo_t = wbig[:E, :E]
    bo = brow[0:1, EH3:EH3 + E]
    attn_out = jnp.dot(acc, wo_t, preferred_element_type=jnp.float32) + bo

    # --- LayerNorm(embed_size), eps = 1e-5 (PyTorch default).
    lnw = brow[0:1, EH3 + E:EH3 + 2 * E]
    lnb = brow[0:1, EH3 + 2 * E:EH3 + 3 * E]
    mean = jnp.mean(attn_out, axis=-1, keepdims=True)
    var = jnp.mean((attn_out - mean) ** 2, axis=-1, keepdims=True)
    normed = (attn_out - mean) * lax.rsqrt(var + 1e-5)
    normed = normed * lnw + lnb

    # --- residual with the feature-repeated src, then the final Linear.
    # torch's src.repeat(1, 1, n): [x0, x1, x0, x1, ...]  == concat of n copies.
    src_tiled = jnp.concatenate([src] * n_rep, axis=1)            # (L, E)
    resid = src_tiled + normed                                    # (L, E)
    # ones-column folds bf (last row of wbig[:, E:]) into the matmul, and the
    # dot_general emits the result already transposed -> lane-dense store.
    resid_aug = jnp.concatenate(
        [resid, jnp.ones((L, 1), jnp.float32)], axis=1)           # (L, E+1)
    wf_aug = wbig[:, E:]                                          # (E+1, dim_in)
    yT = lax.dot_general(wf_aug, resid_aug, (((0,), (1,)), ((), ())),
                         preferred_element_type=jnp.float32)      # (dim_in, L)
    o_ref[...] = yT.astype(o_ref.dtype)


def _fold_repeat(w_t, d, n_rep):
    """Fold torch's .repeat(1,1,n) over the contraction dim of a (E, out) weight.

    x_tiled[:, e] == src[:, e % d]  =>  W_fold[i, :] = sum_{e: e % d == i} W_t[e, :].
    """
    E, out = w_t.shape
    return w_t.reshape(n_rep, d, out).sum(axis=0)          # (d, out)


def transformer_forward(src, params):
    """src: (N, L, dim_in) float32. Returns (N, L, dim_in)."""
    N, L, d = src.shape
    E = params["embed_size"]
    H = params["heads"]
    dim_in = params["wf"].shape[0]
    n_rep = E // d
    scale = 1.0 / (E ** 0.5)

    src_f32 = src.astype(jnp.float32)

    # Pre-transpose weights to (in, out), fold feature-repeat + 1/sqrt(E) (Q),
    # and pack everything into three slabs (fewer DMA descriptors / buffers).
    wq_t = params["wq"].T * scale
    wk_t = params["wk"].T
    wv_t = params["wv"].T
    wsmall = jnp.concatenate(
        [_fold_repeat(wq_t, d, n_rep),
         _fold_repeat(wk_t, d, n_rep),
         _fold_repeat(wv_t, d, n_rep)], axis=1)            # (d, 3*E*H)

    wbig = jnp.zeros((E + 1, E + dim_in), jnp.float32)
    wbig = wbig.at[:E, :E].set(params["wo"].T)             # (E, E)
    wbig = wbig.at[:E, E:].set(params["wf"].T)             # (E, dim_in)
    wbig = wbig.at[E, E:].set(params["bf"])                # bf as extra row

    brow = jnp.concatenate(
        [params["bq"] * scale, params["bk"], params["bv"],
         params["bo"], params["ln_w"], params["ln_b"]]).reshape(1, -1)  # (1, 3EH+3E)

    kernel = functools.partial(_transformer_kernel, seq_len=L, embed_size=E,
                               heads=H, dim_in=dim_in, n_rep=n_rep)

    out_t = pl.pallas_call(
        kernel,
        out_shape=jax.ShapeDtypeStruct((N, dim_in, L), jnp.float32),
        grid=(N,),
        in_specs=[
            pl.BlockSpec((None, L, d), lambda b: (b, 0, 0)),          # src, per batch
            pl.BlockSpec((d, 3 * E * H), lambda b: (0, 0)),           # resident weights
            pl.BlockSpec((E + 1, E + dim_in), lambda b: (0, 0)),
            pl.BlockSpec((1, 3 * E * H + 3 * E), lambda b: (0, 0)),
        ],
        out_specs=pl.BlockSpec((None, dim_in, L), lambda b: (b, 0, 0)),
        compiler_params=pltpu.CompilerParams(
            dimension_semantics=("parallel",)),
    )(src_f32, wsmall, wbig, brow)

    # (N, dim_in, L) lane-dense kernel output -> (N, L, dim_in)
    return out_t.transpose(0, 2, 1)


def _reference_forward(src, params):
    """Pure-JAX reference mirroring the PyTorch module semantics."""
    N, L, d = src.shape
    E = params["embed_size"]
    H = params["heads"]
    n_rep = E // d
    x = jnp.tile(src, (1, 1, n_rep)).astype(jnp.float32)   # (N, L, E)
    mask = jnp.tril(jnp.ones((L, L), jnp.float32))         # (L, L)

    q = x @ params["wq"].T + params["bq"]
    k = x @ params["wk"].T + params["bk"]
    v = x @ params["wv"].T + params["bv"]
    q = q.reshape(N, L, H, E)
    k = k.reshape(N, L, H, E)
    v = v.reshape(N, L, H, E)
    energy = jnp.einsum("nqhd,nkhd->nhqk", q, k)
    energy = jnp.where(mask[None, None] == 0, 0.0, energy)
    attn = energy / (E ** 0.5)
    out = jnp.einsum("nhql,nlhd->nqhd", attn, v).sum(2)    # (N, L, E)
    out = out @ params["wo"].T + params["bo"]

    mean = out.mean(-1, keepdims=True)
    var = ((out - mean) ** 2).mean(-1, keepdims=True)
    normed = (out - mean) / jnp.sqrt(var + 1e-5)
    normed = normed * params["ln_w"] + params["ln_b"]

    resid = x + normed
    return resid @ params["wf"].T + params["bf"]


def make_params(key, dim_in=2, embed_size=16, heads=1):
    ks = jax.random.split(key, 10)
    E, H = embed_size, heads

    def linear(k, out_f, in_f):
        bound = 1.0 / np.sqrt(in_f)
        kw, kb = jax.random.split(k)
        w = jax.random.uniform(kw, (out_f, in_f), jnp.float32, -bound, bound)
        b = jax.random.uniform(kb, (out_f,), jnp.float32, -bound, bound)
        return w, b

    wq, bq = linear(ks[0], E * H, E)
    wk, bk = linear(ks[1], E * H, E)
    wv, bv = linear(ks[2], E * H, E)
    wo, bo = linear(ks[3], E, E)
    wf, bf = linear(ks[4], dim_in, E)
    return {
        "embed_size": E, "heads": H,
        "wq": wq, "bq": bq, "wk": wk, "bk": bk, "wv": wv, "bv": bv,
        "wo": wo, "bo": bo,
        "ln_w": jnp.ones((E,), jnp.float32), "ln_b": jnp.zeros((E,), jnp.float32),
        "wf": wf, "bf": bf,
    }


if __name__ == "__main__":
    key = jax.random.PRNGKey(0)
    k_param, k_x = jax.random.split(key)

    N, L, dim_in, embed_size, heads = 2, 8, 2, 16, 1
    params = make_params(k_param, dim_in=dim_in, embed_size=embed_size, heads=heads)
    src = jax.random.normal(k_x, (N, L, dim_in), jnp.float32)

    out = transformer_forward(src, params)
    out = jax.block_until_ready(out)

    ref = _reference_forward(src, params)
    np.testing.assert_allclose(np.asarray(out), np.asarray(ref), rtol=1e-5, atol=1e-5)

    print("KERNEL_OK")
</pallas_src>

<mosaic_0001>
module attributes {stable_mosaic.version = 11 : i64} {
  func.func @_transformer_kernel(%arg0: i32, %arg1: memref<1x8x2xf32, #tpu.memory_space<vmem>>, %arg2: memref<2x48xf32, #tpu.memory_space<vmem>>, %arg3: memref<17x18xf32, #tpu.memory_space<vmem>>, %arg4: memref<1x96xf32, #tpu.memory_space<vmem>>, %arg5: memref<1x2x8xf32, #tpu.memory_space<vmem>>) attributes {dimension_semantics = [#tpu.dimension_semantics<parallel>], iteration_bounds = array<i64: 2>, scalar_prefetch = 0 : i64, scratch_operands = 0 : i64, tpu.core_type = #tpu.core_type<tc>, window_params = [{transform_indices = @transform_0, window_bounds = array<i64: 1, 8, 2>}, {pipeline_mode = #tpu.pipeline_mode<synchronous>, transform_indices = @transform_1, window_bounds = array<i64: 2, 48>}, {pipeline_mode = #tpu.pipeline_mode<synchronous>, transform_indices = @transform_2, window_bounds = array<i64: 17, 18>}, {pipeline_mode = #tpu.pipeline_mode<synchronous>, transform_indices = @transform_3, window_bounds = array<i64: 1, 96>}, {transform_indices = @transform_4, window_bounds = array<i64: 1, 2, 8>}]} {
    %c0 = arith.constant 0 : index
    %c0_0 = arith.constant 0 : index
    %c0_1 = arith.constant 0 : index
    %0 = vector.load %arg1[%c0, %c0_0, %c0_1] : memref<1x8x2xf32, #tpu.memory_space<vmem>>, vector<1x8x2xf32>
    %1 = vector.shape_cast %0 : vector<1x8x2xf32> to vector<8x2xf32>
    %c0_2 = arith.constant 0 : index
    %c0_3 = arith.constant 0 : index
    %2 = vector.load %arg2[%c0_2, %c0_3] : memref<2x48xf32, #tpu.memory_space<vmem>>, vector<2x48xf32>
    %c0_4 = arith.constant 0 : index
    %c0_5 = arith.constant 0 : index
    %3 = vector.load %arg3[%c0_4, %c0_5] : memref<17x18xf32, #tpu.memory_space<vmem>>, vector<17x18xf32>
    %c0_6 = arith.constant 0 : index
    %c0_7 = arith.constant 0 : index
    %4 = vector.load %arg4[%c0_6, %c0_7] : memref<1x96xf32, #tpu.memory_space<vmem>>, vector<1x96xf32>
    %5 = vector.extract_strided_slice %4 {offsets = [0, 0], sizes = [1, 48], strides = [1, 1]} : vector<1x96xf32> to vector<1x48xf32>
    %6 = vector.extract_strided_slice %1 {offsets = [0, 0], sizes = [8, 1], strides = [1, 1]} : vector<8x2xf32> to vector<8x1xf32>
    %7 = vector.extract_strided_slice %2 {offsets = [0, 0], sizes = [1, 48], strides = [1, 1]} : vector<2x48xf32> to vector<1x48xf32>
    %8 = vector.broadcast %6 : vector<8x1xf32> to vector<8x48xf32>
    %9 = vector.broadcast %7 : vector<1x48xf32> to vector<8x48xf32>
    %10 = arith.mulf %8, %9 : vector<8x48xf32>
    %11 = vector.broadcast %5 : vector<1x48xf32> to vector<8x48xf32>
    %12 = arith.addf %11, %10 : vector<8x48xf32>
    %13 = vector.extract_strided_slice %1 {offsets = [0, 1], sizes = [8, 1], strides = [1, 1]} : vector<8x2xf32> to vector<8x1xf32>
    %14 = vector.extract_strided_slice %2 {offsets = [1, 0], sizes = [1, 48], strides = [1, 1]} : vector<2x48xf32> to vector<1x48xf32>
    %15 = vector.broadcast %13 : vector<8x1xf32> to vector<8x48xf32>
    %16 = vector.broadcast %14 : vector<1x48xf32> to vector<8x48xf32>
    %17 = arith.mulf %15, %16 : vector<8x48xf32>
    %18 = arith.addf %12, %17 : vector<8x48xf32>
    %19 = tpu.iota {dimensions = array<i32: 0>} : vector<8x8xi32>
    %20 = tpu.iota {dimensions = array<i32: 1>} : vector<8x8xi32>
    %21 = arith.cmpi sge, %19, %20 : vector<8x8xi32>
    %22 = vector.extract_strided_slice %18 {offsets = [0, 0], sizes = [8, 16], strides = [1, 1]} : vector<8x48xf32> to vector<8x16xf32>
    %23 = vector.extract_strided_slice %18 {offsets = [0, 16], sizes = [8, 16], strides = [1, 1]} : vector<8x48xf32> to vector<8x16xf32>
    %24 = vector.extract_strided_slice %18 {offsets = [0, 32], sizes = [8, 16], strides = [1, 1]} : vector<8x48xf32> to vector<8x16xf32>
    %cst = arith.constant dense<0.000000e+00> : vector<8x8xf32>
    %25 = tpu.matmul %22, %23, %cst {dimension_numbers = #tpu.dot_dimension_numbers<[1], [1], [0], [0], [0, 0, 1, 0], [], []>} : vector<8x16xf32>, vector<8x16xf32>, vector<8x8xf32> -> vector<8x8xf32>
    %cst_8 = arith.constant 0.000000e+00 : f32
    %26 = vector.broadcast %cst_8 : f32 to vector<8x8xf32>
    %27 = arith.select %21, %25, %26 : vector<8x8xi1>, vector<8x8xf32>
    %cst_9 = arith.constant dense<0.000000e+00> : vector<8x16xf32>
    %28 = tpu.matmul %27, %24, %cst_9 {dimension_numbers = #tpu.dot_dimension_numbers<[1], [0], [0], [1], [0, 0, 1, 1], [], []>} : vector<8x8xf32>, vector<8x16xf32>, vector<8x16xf32> -> vector<8x16xf32>
    %29 = vector.extract_strided_slice %3 {offsets = [0, 0], sizes = [16, 16], strides = [1, 1]} : vector<17x18xf32> to vector<16x16xf32>
    %30 = vector.extract_strided_slice %4 {offsets = [0, 48], sizes = [1, 16], strides = [1, 1]} : vector<1x96xf32> to vector<1x16xf32>
    %cst_10 = arith.constant dense<0.000000e+00> : vector<8x16xf32>
    %31 = tpu.matmul %28, %29, %cst_10 {dimension_numbers = #tpu.dot_dimension_numbers<[1], [0], [0], [1], [0, 0, 1, 1], [], []>} : vector<8x16xf32>, vector<16x16xf32>, vector<8x16xf32> -> vector<8x16xf32>
    %32 = vector.broadcast %30 : vector<1x16xf32> to vector<8x16xf32>
    %33 = arith.addf %31, %32 : vector<8x16xf32>
    %34 = vector.extract_strided_slice %4 {offsets = [0, 64], sizes = [1, 16], strides = [1, 1]} : vector<1x96xf32> to vector<1x16xf32>
    %35 = vector.extract_strided_slice %4 {offsets = [0, 80], sizes = [1, 16], strides = [1, 1]} : vector<1x96xf32> to vector<1x16xf32>
    %cst_11 = arith.constant dense<0.000000e+00> : vector<8xf32>
    %36 = vector.multi_reduction <add>, %33, %cst_11 [1] : vector<8x16xf32> to vector<8xf32>
    %37 = vector.shape_cast %36 : vector<8xf32> to vector<8x1xf32>
    %cst_12 = arith.constant 1.600000e+01 : f32
    %38 = vector.broadcast %cst_12 : f32 to vector<8x1xf32>
    %39 = arith.divf %37, %38 : vector<8x1xf32>
    %40 = vector.broadcast %39 : vector<8x1xf32> to vector<8x16xf32>
    %41 = arith.subf %33, %40 : vector<8x16xf32>
    %42 = arith.mulf %41, %41 : vector<8x16xf32>
    %cst_13 = arith.constant dense<0.000000e+00> : vector<8xf32>
    %43 = vector.multi_reduction <add>, %42, %cst_13 [1] : vector<8x16xf32> to vector<8xf32>
    %44 = vector.shape_cast %43 : vector<8xf32> to vector<8x1xf32>
    %cst_14 = arith.constant 1.600000e+01 : f32
    %45 = vector.broadcast %cst_14 : f32 to vector<8x1xf32>
    %46 = arith.divf %44, %45 : vector<8x1xf32>
    %47 = vector.broadcast %39 : vector<8x1xf32> to vector<8x16xf32>
    %48 = arith.subf %33, %47 : vector<8x16xf32>
    %cst_15 = arith.constant 9.99999974E-6 : f32
    %49 = vector.broadcast %cst_15 : f32 to vector<8x1xf32>
    %50 = arith.addf %46, %49 : vector<8x1xf32>
    %51 = math.rsqrt %50 : vector<8x1xf32>
    %52 = vector.broadcast %51 : vector<8x1xf32> to vector<8x16xf32>
    %53 = arith.mulf %48, %52 : vector<8x16xf32>
    %54 = vector.broadcast %34 : vector<1x16xf32> to vector<8x16xf32>
    %55 = arith.mulf %53, %54 : vector<8x16xf32>
    %56 = vector.broadcast %35 : vector<1x16xf32> to vector<8x16xf32>
    %57 = arith.addf %55, %56 : vector<8x16xf32>
    %58 = tpu.concatenate %1, %1, %1, %1, %1, %1, %1, %1 in 1 : vector<8x2xf32>, vector<8x2xf32>, vector<8x2xf32>, vector<8x2xf32>, vector<8x2xf32>, vector<8x2xf32>, vector<8x2xf32>, vector<8x2xf32> -> vector<8x16xf32>
    %59 = arith.addf %58, %57 : vector<8x16xf32>
    %cst_16 = arith.constant 1.000000e+00 : f32
    %60 = vector.broadcast %cst_16 : f32 to vector<8x1xf32>
    %61 = tpu.concatenate %59, %60 in 1 : vector<8x16xf32>, vector<8x1xf32> -> vector<8x17xf32>
    %62 = vector.extract_strided_slice %3 {offsets = [0, 16], sizes = [17, 2], strides = [1, 1]} : vector<17x18xf32> to vector<17x2xf32>
    %cst_17 = arith.constant dense<0.000000e+00> : vector<2x8xf32>
    %63 = tpu.matmul %62, %61, %cst_17 {dimension_numbers = #tpu.dot_dimension_numbers<[0], [1], [1], [0], [0, 1, 1, 0], [], []>} : vector<17x2xf32>, vector<8x17xf32>, vector<2x8xf32> -> vector<2x8xf32>
    %c0_18 = arith.constant 0 : index
    %c0_19 = arith.constant 0 : index
    %c0_20 = arith.constant 0 : index
    %64 = vector.load %arg5[%c0_18, %c0_19, %c0_20] : memref<1x2x8xf32, #tpu.memory_space<vmem>>, vector<1x2x8xf32>
    %65 = vector.shape_cast %64 : vector<1x2x8xf32> to vector<2x8xf32>
    %66 = vector.shape_cast %63 : vector<2x8xf32> to vector<1x2x8xf32>
    tpu.vector_store %arg5[%c0_18, %c0_19, %c0_20], %66 {strides = array<i32>} : memref<1x2x8xf32, #tpu.memory_space<vmem>>, vector<1x2x8xf32>,
    return
  }
  func.func @transform_0(%arg0: i32) -> (i32, i32, i32) {
    %c0_i32 = arith.constant 0 : i32
    %c0_i32_0 = arith.constant 0 : i32
    %c0_i32_1 = arith.constant 0 : i32
    return %arg0, %c0_i32, %c0_i32_0 : i32, i32, i32
  }
  func.func @transform_1(%arg0: i32) -> (i32, i32) {
    %c0_i32 = arith.constant 0 : i32
    %c0_i32_0 = arith.constant 0 : i32
    %c0_i32_1 = arith.constant 0 : i32
    return %c0_i32, %c0_i32_0 : i32, i32
  }
  func.func @transform_2(%arg0: i32) -> (i32, i32) {
    %c0_i32 = arith.constant 0 : i32
    %c0_i32_0 = arith.constant 0 : i32
    %c0_i32_1 = arith.constant 0 : i32
    return %c0_i32, %c0_i32_0 : i32, i32
  }
  func.func @transform_3(%arg0: i32) -> (i32, i32) {
    %c0_i32 = arith.constant 0 : i32
    %c0_i32_0 = arith.constant 0 : i32
    %c0_i32_1 = arith.constant 0 : i32
    return %c0_i32, %c0_i32_0 : i32, i32
  }
  func.func @transform_4(%arg0: i32) -> (i32, i32, i32) {
    %c0_i32 = arith.constant 0 : i32
    %c0_i32_0 = arith.constant 0 : i32
    %c0_i32_1 = arith.constant 0 : i32
    return %arg0, %c0_i32, %c0_i32_0 : i32, i32, i32
  }
}

</mosaic_0001>

<bundles_post_ra>
// kernel: tpu_custom_call.1
= control target key start
LH: loop header
LB: loop body
LE: loop exit
PB: predicated region body
PF: predicated region fallthrough
CT: control target
= control target key end

     0   :  { %9 = vsyncpa [#allocation3], 0  ;;  %s1154_s0 = inlined_call_operand.vmem [shape: f32[2,8,2], index: 0, kind: input, shape index: {}]   ;;  %s1155_s1 = inlined_call_operand.vmem [shape: f32[2,48], index: 1, kind: input, shape index: {}]   ;;  %s1156_s2 = inlined_call_operand.hbm [shape: f32[17,18], index: 2, kind: input, shape index: {}]   ;;  %s1157_s3 = inlined_call_operand.vmem [shape: f32[1,96], index: 3, kind: input, shape index: {}]   ;;  %s1158_s4 = inlined_call_operand.hbm [shape: f32[2,2,8], index: 4, kind: output, shape index: {}]  }
   0x1   :  { %10 = vsyncpa [#allocation4], 0 }
   0x2   :  { %12 = vsyncpa [#allocation4 + $0x1], 0  ;;  %s1003_s15 = smov 0   ;;  %s1005_s16 = smov 0  }
   0x3   :  { %s1007_s17 = smov 0   ;;  %s1009_s18 = smov 0  }
   0x4 LB: > { %s1024_s19 = sadd.s32 4294967295, %s956_s18   ;;  %s744_s20 = sadd.s32 4294967294, %s956_s18   ;;  %s956_s18 = sphi %s1009_s18, %s1166_s18   ;;  %s952_s17 = sphi %s1007_s17, %s1165_s17   ;;  %s948_s16 = sphi %s1005_s16, %s1164_s16   ;;  %s944_s15 = sphi %s1003_s15, %s1163_s15  }
   0x5   : > { %s1028_s21 = sadd.s32 1, %s956_s18   ;;  %s114_s22 = sadd.s32 1, %s952_s17 }
   0x6   : > { %s111_s23 = ssub.s32 %s956_s18, %s1028_s21  ;;  %p124_p0 = scmp.ne.s32.totalorder %s952_s17, %s948_s16 }
   0x7   : > { %p112_p1 = scmp.eq.s32.totalorder %s111_s23, 0  ;;  %p125_p2 = scmp.eq.s32.totalorder %s1024_s19, 1 }
   0x8   : > { %p130_p3 = scmp.ne.s32.totalorder %s948_s16, %s944_s15  ;;  %p131_p4 = scmp.eq.s32.totalorder %s744_s20, 1 }
   0x9   : > { %s1039_s24 = scalar_select %p112_p1, %s952_s17, %s114_s22  }
   0xa   : > { %p1041_p5 = por %p125_p2, %p124_p0  ;;  %p1045_p6 = por %p131_p4, %p130_p3 }
   0xb   : > { %p745_p7 = scmp.ge.s32.totalorder %s956_s18, 1  ;;  %p138_p8 = scmp.lt.s32.totalorder %s956_s18, 3 }
   0xc   : > { %s1160_s26 = scalar_select %p1045_p6, 1, 0 }
   0xd   : > { %p808_p9 = scmp.eq.s32.totalorder %s1024_s19, 0  ;;  %p1052_p10 = pnand %p745_p7, %p138_p8 }
   0xe   : > { %s958_s28 = smov [#allocation2]  }
   0xf   : > { %s153_s29 = sshll.u32 %s958_s28, 4  ;;  %p800_p11 = pneg %p1052_p10  ;;  %s154_s29 = int_to_ptr.vmem [resolvable:$true] %s153_s29 }
  0x10   : > { %s877_s30 = scalar_lea.vmem %s154_s29, 384  ;;  %p885_p3 = scmp.lt.s32.totalorder %s154_s29, %s154_s29 }
  0x11   : > { %p801_p12 = pnand %p808_p9, %p800_p11  ;;  %p878_p0 = scmp.ne.s32.totalorder %s154_s29, %s877_s30 }
  0x12   : > { %p886_p4 = scmp.lt.s32.totalorder %s877_s30, %s877_s30 }
  0x13   : > { %p868_p13 = pneg %p801_p12 }
  0x14   : > { %p887_p6 = por %p886_p4, %p885_p3 }
  0x15   : > { %p880_p1 = pnand %p878_p0, %p868_p13 }
  0x17   : > { %p881_p2 = pneg %p880_p1 }
  0x19   : > { %p888_p7 = pnand %p887_p6, %p881_p2 }
  0x1b   : > { %891 = shalt.err (!%p888_p7)
}
  0x1c   : > { %s959_s5 = smov 128   ;;  %s960_s6 = smov 8  }
  0x1d   : > { %803 = dma.hbm_to_vmem [thread:$0]  (!%p801_p12), %s1156_s2, 384, %s154_s29, [#allocation3], %s959_s5, %s959_s5, %s960_s6  }
  0x1e   : > { %179 = sbr.rel (%p1052_p10) target bundleno = 1397 (0x575), region = 36 }
  0x23   : > { %935 = dma.done.wait (%p808_p9), [#allocation3], 384  }
  0x24   : > { %937 = vsyncadd (%p808_p9), [#allocation3], 4294966912  ;;  %p204_p8 = scmp.lt.s32.totalorder %s1024_s19, 1  ;;  %v961_v0 = vmov 0   ;;  %v962_v2 = vmov 1   ;;  %v963_v3 = vmov 0.0   ;;  %v219_v4 = vlaneseq }
  0x25   : > { %862 = vset.pattern.permute.xlu0 %v961_v0  ;;  %772 = vmatprep.subr.mxu0 %v963_v3  ;;  %v209_v7 = vld [vmem:[%s1155_s1] sm:$0x3]  ;;  %vm964_vm0 = vmmov 0   ;;  %s965_s27 = smov 112   ;;  %s966_s28 = smov 96   ;;  %vm249_vm1 = vcmask 130048  }
  0x26   : > { %s205_s9 = scalar_select %p204_p8, %s1024_s19, 1  ;;  %777 = vmatprep.subr.mxu1 %v963_v3  ;;  %v220_v5 = vshrl.u32 %v219_v4, 7  ;;  %774 = vmatprep.mubr.msk.f32.mxu0 %vm964_vm0, %v963_v3  ;;  %v752_v13 = vld [vmem:[%s1157_s3] ss:$0 sm:$0xff]  ;;  %v244_v20 = vand.u32 127, %v219_v4  ;;  %vm328_vm3 = vcmask 64512  }
  0x27   : > { %779 = vmatprep.mubr.msk.f32.mxu1 %vm964_vm0, %v963_v3  ;;  %v211_v22 = vld [vmem:[#allocation2 + $0x8] sm:$0xff]  ;;  %v210_v25 = vld [vmem:[#allocation2] sm:$0xff]  ;;  %s967_s29 = smov 80   ;;  %s968_s30 = smov 2   ;;  %v212_v33 = vld [vmem:[#allocation2 + $0x10] sm:$0x1] }
  0x28   : > { %s751_s10 = sshll.u32 %s205_s9, 3  ;;  %v221_v6 = vsub.s32 0, %v220_v5  ;;  %v237_v9 = vsub.s32 1, %v220_v5  ;;  %vm245_vm2 = vcmp.ge.s32.totalorder %v220_v5, %v244_v20  ;;  %s969_s5 = smov 6   ;;  %vm521_vm4 = vcmask 15360  }
  0x29   : > { %s207_s13 = scalar_lea.vmem %s1154_s0, %s751_s10  ;;  %s970_s6 = smov 8   ;;  %vm523_vm5 = vcmask 31744   ;;  %vm525_vm6 = vcmask 48128   ;;  %vm528_vm7 = vcmask 80896   ;;  %vm530_vm8 = vcmask 97280  }
  0x2a   : > { %v1074_v1 = vld [vmem:[%s207_s13] sm:$0xff]  ;;  %v222_v8 = vrot.slane %v209_v7, %v221_v6  ;;  %v238_v12 = vrot.slane %v209_v7, %v237_v9  ;;  %s971_s7 = smov 48   ;;  %s972_s8 = smov 4   ;;  %vm532_vm9 = vcmask 113664   ;;  %vm580_vm10 = vcmask 138240  }
  0x2b   : > { %216 = vperm.xlu0 %862, %v1074_v1   ;;  %s973_s9 = smov 64   ;;  %s974_s10 = smov 10   ;;  %vm657_vm11 = vcmask 58368  }
  0x2c   : > { %s975_s11 = smov 12   ;;  %s976_s12 = smov 14  }
  0x2d   : > { %s201_s13 = sand.u32 1, %s948_s16   ;;  %s760_s20 = sshll.u32 %s1024_s19, 5 }
  0x2e   : > { %s750_s14 = sshll.u32 %s201_s13, 1  ;;  %s977_s19 = smov [#allocation5]  }
  0x2f   : > { %863 = vset.pattern.permute.xlu0 %v962_v2  ;;  %s203_s22 = scalar_lea.vmem [#allocation5], %s750_s14 }
  0x30   : > { %232 = vperm.xlu0 %863, %v1074_v1   ;;  %s673_s23 = sshll.u32 %s203_s22, 4  ;;  %s1115_s23 = int_to_ptr.vmem [resolvable:$true] %s673_s23 }
  0xa6   : > { %v217_v10 = vpop.permute.xlu0 %216 }
  0xa7   : > { %v223_v11 = vmul.f32 %v222_v8, %v217_v10 }
  0xa9   : > { %v230_v15 = vadd.f32 %v752_v13, %v223_v11 }
  0xab   : > { %v233_v14 = vpop.permute.xlu0 %232 }
  0xac   : > { %v239_v16 = vmul.f32 %v238_v12, %v233_v14 }
  0xae   : > { %v240_v17 = vadd.f32 %v239_v16, %v230_v15 }
  0xb0   : > { %247 = vrot.lane.b32.xlu1 %v240_v17, %s965_s27 }
  0xb4   : > { %325 = vrot.lane.b32.xlu1 %v240_v17, %s966_s28 }
  0xb8   : > { %402 = vrot.lane.b32.xlu1 %v752_v13, %s967_s29  ;;  %s1113_s29 = scalar_lea.hbm %s1158_s4, %s760_s20 }
  0xbc   : > { %541 = vrot.lane.b32.xlu1 %v211_v22, %s965_s27 }
  0xc0   : > { %500 = vrot.lane.b32.xlu1 %v1074_v1, %s968_s30  ;;  %s660_s30 = scalar_lea.sflag [#allocation4], %s201_s13 }
  0xc4   : > { %506 = vrot.lane.b32.xlu1 %v1074_v1, %s969_s5  ;;  %s892_s5 = scalar_lea.vmem %s1115_s23, 32 }
  0xc5   : > { %p893_p6 = scmp.ne.s32.totalorder %s1115_s23, %s892_s5 }
  0xc7   : > { %p894_p9 = pnand %p893_p6, %p1041_p5 }
  0xc8   : > { %509 = vrot.lane.b32.xlu1 %v1074_v1, %s970_s6  ;;  %s896_s6 = sshll.u32 %s977_s19, 4  ;;  %s897_s6 = int_to_ptr.vmem [resolvable:$false] %s896_s6 }
  0xc9   : > { %p895_p10 = pneg %p894_p9  ;;  %p899_p11 = scmp.lt.s32.totalorder %s1115_s23, %s897_s6 }
  0xcc   : > { %496 = vrot.lane.b32.xlu1 %v752_v13, %s971_s7  ;;  %s898_s7 = scalar_lea.vmem %s897_s6, 64 }
  0xcd   : > { %p900_p12 = scmp.lt.s32.totalorder %s898_s7, %s892_s5 }
  0xcf   : > { %p901_p13 = por %p900_p12, %p899_p11 }
  0xd1   : > { %p902_p0 = pnand %p901_p13, %p895_p10 }
 0x122   : > { %v248_v18 = vpop.permute.xlu1 %247 }
 0x123   : > { %773 = vmatpush3.xpose.msk.msra.mxu0 %vm249_vm1, %v248_v18 }
 0x124   : > { %789 = vmatprep.subr.mxu0 %v963_v3 }
 0x126   : > { %775 = vmatmul.mubr.msk.f32.vlgmr.msra.gmra.mxu0 %vm249_vm1, %v240_v17  ;;  %v326_v19 = vpop.permute.xlu1 %325 }
 0x127   : > { %778 = vmatpush3.msra.mxu1 %v326_v19  ;;  %791 = vmatprep.mubr.msk.f32.mxu0 %vm964_vm0, %v963_v3 }
 0x128   : > { %782 = vmatprep.subr.mxu1 %v963_v3 }
 0x12a   : > { %v403_v28 = vpop.permute.xlu1 %402 }
 0x12e   : > { %v542_v39 = vpop.permute.xlu1 %541 }
 0x132   : > { %v501_v42 = vpop.permute.xlu1 %500 }
 0x133   : > { %v522_v50 = vsel %vm521_vm4, %v1074_v1, %v501_v42 }
 0x136   : > { %v507_v43 = vpop.permute.xlu1 %506 }
 0x13a   : > { %v510_v44 = vpop.permute.xlu1 %509 }
 0x13e   : > { %v497_v45 = vpop.permute.xlu1 %496 }
 0x1e6   : > { %v320_v21 = vpop.f32.mrf.mxu0 }
 0x1e7   : > { %v324_v23 = vsel %vm245_vm2, %v320_v21, 0.0 }
 0x1e8   : > { %v776_v24 = vpop.f32.mrf.mxu0  ;;  %780 = vmatmul.mubr.msk.f32.vlgmr.msra.gmra.mxu1 %vm328_vm3, %v324_v23 }
 0x1e9   : > { %783 = vmatpush3.msra.mxu1 %v211_v22  ;;  %786 = vmatprep.mubr.msk.f32.mxu1 %vm964_vm0, %v963_v3 }
 0x1ea   : > { %784 = vmatprep.subr.mxu1 %v963_v3 }
 0x1eb   : > { %785 = vmatpush3.msra.mxu1 %v210_v25 }
 0x2a8   : > { %v398_v26 = vpop.f32.mrf.mxu1 }
 0x2a9   : > { %787 = vmatmul.mubr.msk.f32.vlgmr.msra.gmra.mxu1 %vm249_vm1, %v398_v26 }
 0x2aa   : > { %v781_v27 = vpop.f32.mrf.mxu1 }
 0x369   : > { %v474_v29 = vpop.f32.mrf.mxu1 }
 0x36a   : > { %v475_v30 = vadd.f32 %v474_v29, %v403_v28 }
 0x36b   : > { %v788_v31 = vpop.f32.mrf.mxu1 }
 0x36c   : > { %v478_v32 = vsel %vm249_vm1, %v475_v30, 0.0 }
 0x36d   : > { %479 = vadd.xlane.f32.xlu0 %v478_v32 }
 0x383   : > { %539 = vrot.lane.b32.xlu0 %v210_v25, %s965_s27 }
 0x387   : > { %543 = vrot.lane.b32.xlu0 %v212_v33, %s965_s27 }
 0x38b   : > { %503 = vrot.lane.b32.xlu0 %v1074_v1, %s972_s8 }
 0x38f   : > { %492 = vrot.lane.b32.xlu0 %v752_v13, %s973_s9 }
 0x393   : > { %512 = vrot.lane.b32.xlu0 %v1074_v1, %s974_s10 }
 0x397   : > { %515 = vrot.lane.b32.xlu0 %v1074_v1, %s975_s11 }
 0x3f6   : > { %v480_v34 = vpop.xlane.xlu0 %479 }
 0x3f7   : > { %v482_v35 = vmul.f32 0.0625, %v480_v34 }
 0x3f9   : > { %v483_v36 = vsub.f32 %v475_v30, %v482_v35 }
 0x3fa   : > { %v540_v37 = vpop.permute.xlu0 %539 }
 0x3fb   : > { %v484_v38 = vmul.f32 %v483_v36, %v483_v36  ;;  %548 = vxpose.xlu0.b32.start [1/3] (short) (narrow) %v540_v37, 8 }
 0x3fd   : > { %v485_v40 = vsel %vm249_vm1, %v484_v38, 0.0 }
 0x3fe   : > { %486 = vadd.xlane.f32.xlu1 %v485_v40  ;;  %v544_v41 = vpop.permute.xlu0 %543 }
 0x3ff   : > { %549 = vxpose.xlu0.b32.cont [2/3] (short) (narrow) %v542_v39, 8 }
 0x402   : > { %v504_v48 = vpop.permute.xlu0 %503 }
 0x403   : > { %550 = vxpose.xlu0.b32.end [3/3] (short) (narrow) %v544_v41, 8  ;;  %v524_v52 = vsel %vm523_vm5, %v522_v50, %v504_v48 }
 0x404   : > { %v526_v53 = vsel %vm525_vm6, %v524_v52, %v507_v43 }
 0x405   : > { %v527_v55 = vsel %vm328_vm3, %v526_v53, %v510_v44 }
 0x406   : > { %v493_v51 = vpop.permute.xlu0 %492 }
 0x40a   : > { %v513_v54 = vpop.permute.xlu0 %512 }
 0x40b   : > { %v529_v59 = vsel %vm528_vm7, %v527_v55, %v513_v54 }
 0x40e   : > { %v516_v58 = vpop.permute.xlu0 %515 }
 0x40f   : > { %518 = vrot.lane.b32.xlu1 %v1074_v1, %s976_s12  ;;  %v531_v62 = vsel %vm530_vm8, %v529_v59, %v516_v58 }
 0x477   : > { %v564_v3 = vpop.trf.xlu0 }
 0x487   : > { %v487_v46 = vpop.xlane.xlu1 %486 }
 0x488   : > { %v488_v47 = vmul.f32 0.0625, %v487_v46 }
 0x48a   : > { %v489_v49 = vadd.f32 1e-05, %v488_v47 }
 0x48b   : > { %v519_v61 = vpop.permute.xlu1 %518 }
 0x48c   : > { %864 = vrsqrt.f32 %v489_v49  ;;  %v533_v0 = vsel %vm532_vm9, %v531_v62, %v519_v61 }
 0x499   : > { %v865_v56 = vpop.eup %864 }
 0x49a   : > { %v491_v57 = vmul.f32 %v865_v56, %v483_v36 }
 0x49c   : > { %v495_v60 = vmul.f32 %v493_v51, %v491_v57 }
 0x49e   : > { %v499_v63 = vadd.f32 %v497_v45, %v495_v60 }
 0x4a0   : > { %v534_v1 = vadd.f32 %v533_v0, %v499_v63 }
 0x4a2   : > { %v535_v2 = vsel %vm249_vm1, %v534_v1, 1.0 }
 0x4a3   : > { %790 = vmatpush3.xpose.msk.msra.mxu0 %vm580_vm10, %v535_v2 }
 0x4a6   : > { %792 = vmatmul.mubr.msk.f32.vlgmr.msra.gmra.mxu0 %vm580_vm10, %v564_v3 }
 0x566   : > { %v653_v4 = vpop.f32.mrf.mxu0 }
 0x567   : > { %658 = vst.msk [vmem:[%s203_s22] sm:$0x3] %vm657_vm11, %v653_v4 }
 0x568   : > { %v793_v5 = vpop.f32.mrf.mxu0 }
 0x569   : > { %905 = shalt.err (!%p902_p0)
}
 0x56a   : > { %s906_s8 = scalar_lea.hbm %s1113_s29, 32  ;;  %s910_s11 = scalar_lea.hbm %s1158_s4, 64 }
 0x56b   : > { %p907_p1 = scmp.ne.s32.totalorder %s1113_s29, %s906_s8  ;;  %p911_p4 = scmp.lt.s32.totalorder %s1113_s29, %s1158_s4 }
 0x56c   : > { %p912_p7 = scmp.lt.s32.totalorder %s910_s11, %s906_s8 }
 0x56d   : > { %p908_p2 = pnand %p907_p1, %p1041_p5 }
 0x56e   : > { %p913_p8 = por %p912_p7, %p911_p4 }
 0x56f   : > { %p909_p3 = pneg %p908_p2 }
 0x571   : > { %p914_p6 = pnand %p913_p8, %p909_p3 }
 0x573   : > { %917 = shalt.err (!%p914_p6)
}
 0x574   : > { %798 = dma.vmem_to_hbm [thread:$0]  (%p1041_p5), %s1115_s23, 32, %s1113_s29, %s660_s30  }
 0x575 PF: > { %p810_p9 = scmp.ge.s32.totalorder %s956_s18, 2  ;;  %s685_s14 = sand.u32 1, %s944_s15  }
 0x576   : > { %p1162_p10 = scmp.ne.s32.totalorder %s1160_s26, 0  ;;  %s686_s20 = scalar_lea.sflag [#allocation4], %s685_s14 }
 0x578   : > { %p805_p11 = pnand %p810_p9, %p1162_p10 }
 0x57a   : > { %p806_p12 = pneg %p805_p11 }
 0x57c   : > { %939 = dma.done.wait (%p806_p12), %s686_s20, 32  }
 0x57d   : > { %941 = vsyncadd (%p806_p12), %s686_s20, 4294967264  ;;  %p15_p13 = scmp.ge.s32.totalorder %s1028_s21, 4   ;;  %s1163_s15 = smov %s948_s16 }
 0x57e   : > { %s1164_s16 = smov %s952_s17  ;;  %s1165_s17 = smov %s1039_s24 }
 0x57f   : > { %s1166_s18 = smov %s1028_s21  ;;  %17 = sbr.rel (!%p15_p13) target bundleno = 4 (0x4), region = 76 }
 0x584   :  { %691 = vsyncpa [#allocation3], 1 }
 0x585   :  { %693 = vsyncpa [#allocation3 + $0x1], 1 }
 0x586   :  { %694 = vsyncpa [#allocation4], 1 }
 0x587   :  { %696 = vsyncpa [#allocation4 + $0x1], 1 }

</bundles_post_ra>
